<compile_context>
chip_gen: v7x
topology: tpu7x:2x2x1
jax: 0.10.0
libtpu: 0.0.40
codegen_flags: <defaults>
</compile_context>

<pallas_src>
import jax
import jax.numpy as jnp
from jax.experimental import pallas as pl
from jax.experimental.pallas import tpu as pltpu


# Per-grid-step byte budget for the streamed input+output blocks (single
# buffered). Double-buffering doubles it; stays well under v7x's 64 MiB VMEM.
_BLOCK_BUDGET_BYTES = 8 * 1024 * 1024
_MAX_BATCH_BLOCK = 8     # bound the in-kernel static unroll over batched images
_VPU_MAX_CIN = 8         # use the MXU for C_in >= 8
_VPU_MAX_MACS = 256      # C_out * C_in cap for the unrolled VPU kernel


def _outconv_kernel_vpu(x_ref, w_ref, b_ref, o_ref):
    """Dense VPU broadcast-MAC for tiny channel counts.

    x_ref: (bn, C_in, TR, 128)  VMEM, activation dtype
    w_ref: (C_out, C_in)        SMEM, f32 scalars
    b_ref: (C_out,)             SMEM, f32 scalars
    o_ref: (bn, C_out, TR, 128) VMEM, activation dtype

    Pixels occupy both sublanes (TR) and lanes (128) so every vreg is dense;
    the per-channel slab is loaded + cast inside the loop so no full-tile f32
    copy is ever live (bounded vreg/VMEM pressure).
    """
    bn, c_in, _, _ = x_ref.shape
    c_out = o_ref.shape[1]
    tr, lanes = o_ref.shape[2], o_ref.shape[3]
    for b in range(bn):                      # static unroll, bn is small
        for co in range(c_out):
            acc = jnp.full((tr, lanes), b_ref[co], dtype=jnp.float32)
            for ci in range(c_in):           # static unroll over input channels
                acc = acc + w_ref[co, ci] * x_ref[b, ci].astype(jnp.float32)
            o_ref[b, co] = acc.astype(o_ref.dtype)


def _outconv_kernel_mxu(x_ref, w_ref, b_ref, o_ref):
    """MXU path for realistic channel counts: (C_out, C_in) @ (C_in, TP).

    x_ref: (bn, C_in, TP)   VMEM, activation dtype
    w_ref: (C_out, C_in)    VMEM, activation dtype (native bf16 MXU when bf16)
    b_ref: (C_out, 1)       VMEM, f32
    o_ref: (bn, C_out, TP)  VMEM, activation dtype
    """
    bn = x_ref.shape[0]
    w = w_ref[...]
    bias = b_ref[...]
    for b in range(bn):                      # static unroll, bn is small
        acc = jnp.dot(w, x_ref[b], preferred_element_type=jnp.float32)
        o_ref[b] = (acc + bias).astype(o_ref.dtype)


@jax.jit
def outconv_pallas(x_nchw, weight, bias):
    """1x1 conv forward (== OutConv.forward).

    x_nchw: (N, C_in, H, W)
    weight: (C_out, C_in) or (C_out, C_in, 1, 1)
    bias:   (C_out,)
    returns (N, C_out, H, W)
    """
    if weight.ndim == 4:
        weight = weight[:, :, 0, 0]
    N, C_in, H, W = x_nchw.shape
    C_out = weight.shape[0]
    hw = H * W
    dtype = x_nchw.dtype
    itemsize = jnp.dtype(dtype).itemsize

    use_vpu = (C_in < _VPU_MAX_CIN and C_out * C_in <= _VPU_MAX_MACS
               and hw % 128 == 0)

    # Pixels per step from the byte budget (covers both in and out streams).
    budget_px = max(128, _BLOCK_BUDGET_BYTES // ((C_in + C_out) * itemsize))

    cost = pl.CostEstimate(
        flops=2 * N * hw * C_in * C_out,
        transcendentals=0,
        bytes_accessed=(N * hw * (C_in + C_out) * itemsize
                        + weight.size * jnp.dtype(weight.dtype).itemsize
                        + bias.size * jnp.dtype(bias.dtype).itemsize),
    )

    if use_vpu:
        # Dense layout: pixels in sublanes + lanes.  Free reshape.
        rows = hw // 128
        x_in = x_nchw.reshape(N, C_in, rows, 128)
        w_in = weight.astype(jnp.float32)          # SMEM scalars
        b_in = bias.astype(jnp.float32)            # SMEM scalars

        rows_budget = max(8, budget_px // 128)
        if rows_budget >= rows:
            tile_r = rows                           # full image per step
            bn = max(1, min(N, rows_budget // max(rows, 1), _MAX_BATCH_BLOCK))
        else:
            tile_r = max(8, (rows_budget // 8) * 8)  # multiple of 8 sublanes
            bn = 1
        if N > 1:
            bn = min(bn, max(1, N // 2))            # keep >=2 steps for megacore
        grid = (pl.cdiv(N, bn), pl.cdiv(rows, tile_r))

        in_specs = [
            pl.BlockSpec((bn, C_in, tile_r, 128), lambda n, r: (n, 0, r, 0)),
            pl.BlockSpec(memory_space=pltpu.MemorySpace.SMEM),
            pl.BlockSpec(memory_space=pltpu.MemorySpace.SMEM),
        ]
        out_spec = pl.BlockSpec((bn, C_out, tile_r, 128),
                                lambda n, r: (n, 0, r, 0))
        out_shape = jax.ShapeDtypeStruct((N, C_out, rows, 128), dtype)
        kernel = _outconv_kernel_vpu
        block_px = bn * tile_r * 128
    else:
        # Row layout: channels in sublanes, pixels in lanes.  Free reshape.
        x_in = x_nchw.reshape(N, C_in, hw)
        # Native-dtype weights so the MXU runs bf16 x bf16 (f32 accumulate).
        w_in = (weight.astype(dtype) if dtype == jnp.bfloat16
                else weight.astype(jnp.float32))
        b_in = bias.astype(jnp.float32).reshape(C_out, 1)

        tile_px = max(128, (budget_px // 128) * 128)
        if tile_px >= hw:
            tile_px = hw         # full image (legal even when hw % 128 != 0)
            bn = max(1, min(N, budget_px // max(hw, 1), _MAX_BATCH_BLOCK))
        else:
            bn = 1               # tile_px is a multiple of 128; ragged hw masked
        if N > 1:
            bn = min(bn, max(1, N // 2))
        grid = (pl.cdiv(N, bn), pl.cdiv(hw, tile_px))

        in_specs = [
            pl.BlockSpec((bn, C_in, tile_px), lambda n, p: (n, 0, p)),
            pl.BlockSpec((C_out, C_in), lambda n, p: (0, 0)),   # VMEM-resident
            pl.BlockSpec((C_out, 1), lambda n, p: (0, 0)),      # VMEM-resident
        ]
        out_spec = pl.BlockSpec((bn, C_out, tile_px), lambda n, p: (n, 0, p))
        out_shape = jax.ShapeDtypeStruct((N, C_out, hw), dtype)
        kernel = _outconv_kernel_mxu
        block_px = bn * tile_px

    # Double-buffered in/out blocks + resident weight/bias.  Always pass an
    # explicit limit (v5e's scoped default is only 16 MiB); bounded well under
    # v7x's 64 MiB physical VMEM by construction of the budget.
    vmem_needed = (2 * block_px * (C_in + C_out) * itemsize
                   + (weight.size + C_out) * 4)
    vmem_limit = int(min(48 * 1024 * 1024,
                         max(32 * 1024 * 1024, 2 * vmem_needed)))

    out = pl.pallas_call(
        kernel,
        out_shape=out_shape,
        grid_spec=pltpu.PrefetchScalarGridSpec(
            num_scalar_prefetch=0,
            grid=grid,
            in_specs=in_specs,
            out_specs=out_spec,
        ),
        compiler_params=pltpu.CompilerParams(
            dimension_semantics=("parallel", "parallel"),
            vmem_limit_bytes=vmem_limit,
        ),
        cost_estimate=cost,
    )(x_in, w_in, b_in)

    return out.reshape(N, C_out, H, W)


def init_outconv_params(key, in_channels, out_channels):
    """Deterministic PyTorch-style init for Conv2d(in, out, kernel_size=1)."""
    kw, kb = jax.random.split(key)
    fan_in = in_channels * 1 * 1
    bound = 1.0 / (fan_in ** 0.5)
    weight = jax.random.uniform(
        kw, (out_channels, in_channels), jnp.float32, -bound, bound)
    bias = jax.random.uniform(
        kb, (out_channels,), jnp.float32, -bound, bound)
    return weight, bias


if __name__ == "__main__":
    key = jax.random.PRNGKey(0)
    k_x, k_p, k_x2, k_p2 = jax.random.split(key, 4)

    # --- Tiny-channel config (dense VPU path) ---
    N, C_in, H, W = 2, 4, 16, 16
    C_out = 3
    x = jax.random.normal(k_x, (N, C_in, H, W), dtype=jnp.float32)
    weight, bias = init_outconv_params(k_p, C_in, C_out)

    out = jax.block_until_ready(outconv_pallas(x, weight, bias))
    ref = jnp.einsum("nchw,oc->nohw", x, weight) + bias[None, :, None, None]
    assert out.shape == (N, C_out, H, W)
    assert jnp.allclose(out, ref, atol=1e-5, rtol=1e-5)

    # --- Wider-channel config (MXU path, batched block) ---
    N2, C_in2, H2, W2 = 4, 32, 8, 8
    C_out2 = 8
    x2 = jax.random.normal(k_x2, (N2, C_in2, H2, W2), dtype=jnp.float32)
    weight2, bias2 = init_outconv_params(k_p2, C_in2, C_out2)

    out2 = jax.block_until_ready(outconv_pallas(x2, weight2, bias2))
    ref2 = (jnp.einsum("nchw,oc->nohw", x2, weight2)
            + bias2[None, :, None, None])
    assert out2.shape == (N2, C_out2, H2, W2)
    assert jnp.allclose(out2, ref2, atol=2e-2, rtol=2e-2)

    print("KERNEL_OK")
</pallas_src>

<mosaic_0001>
module attributes {stable_mosaic.version = 11 : i64} {
  func.func @_outconv_kernel_vpu(%arg0: i32, %arg1: i32, %arg2: memref<1x4x2x128xf32, #tpu.memory_space<vmem>>, %arg3: memref<3x4xf32, #tpu.memory_space<smem>>, %arg4: memref<3xf32, #tpu.memory_space<smem>>, %arg5: memref<1x3x2x128xf32, #tpu.memory_space<vmem>>) attributes {dimension_semantics = [#tpu.dimension_semantics<parallel>, #tpu.dimension_semantics<parallel>], iteration_bounds = array<i64: 2, 1>, scalar_prefetch = 0 : i64, scratch_operands = 0 : i64, tpu.core_type = #tpu.core_type<tc>, window_params = [{transform_indices = @transform_0, window_bounds = array<i64: 1, 4, 2, 128>}, {transform_indices = @transform_1, window_bounds = array<i64: 3, 4>}, {transform_indices = @transform_2, window_bounds = array<i64: 3>}, {transform_indices = @transform_3, window_bounds = array<i64: 1, 3, 2, 128>}]} {
    %c0 = arith.constant 0 : index
    %0 = memref.load %arg4[%c0] : memref<3xf32, #tpu.memory_space<smem>>
    %1 = vector.broadcast %0 : f32 to vector<2x128xf32>
    %c0_0 = arith.constant 0 : index
    %c0_1 = arith.constant 0 : index
    %2 = memref.load %arg3[%c0_0, %c0_1] : memref<3x4xf32, #tpu.memory_space<smem>>
    %c0_2 = arith.constant 0 : index
    %c0_3 = arith.constant 0 : index
    %c0_4 = arith.constant 0 : index
    %c0_5 = arith.constant 0 : index
    %3 = vector.load %arg2[%c0_2, %c0_3, %c0_4, %c0_5] : memref<1x4x2x128xf32, #tpu.memory_space<vmem>>, vector<1x1x2x128xf32>
    %4 = vector.shape_cast %3 : vector<1x1x2x128xf32> to vector<2x128xf32>
    %5 = vector.broadcast %2 : f32 to vector<2x128xf32>
    %6 = arith.mulf %5, %4 : vector<2x128xf32>
    %7 = arith.addf %1, %6 : vector<2x128xf32>
    %c0_6 = arith.constant 0 : index
    %c1 = arith.constant 1 : index
    %8 = memref.load %arg3[%c0_6, %c1] : memref<3x4xf32, #tpu.memory_space<smem>>
    %c0_7 = arith.constant 0 : index
    %c1_8 = arith.constant 1 : index
    %c0_9 = arith.constant 0 : index
    %c0_10 = arith.constant 0 : index
    %9 = vector.load %arg2[%c0_7, %c1_8, %c0_9, %c0_10] : memref<1x4x2x128xf32, #tpu.memory_space<vmem>>, vector<1x1x2x128xf32>
    %10 = vector.shape_cast %9 : vector<1x1x2x128xf32> to vector<2x128xf32>
    %11 = vector.broadcast %8 : f32 to vector<2x128xf32>
    %12 = arith.mulf %11, %10 : vector<2x128xf32>
    %13 = arith.addf %7, %12 : vector<2x128xf32>
    %c0_11 = arith.constant 0 : index
    %c2 = arith.constant 2 : index
    %14 = memref.load %arg3[%c0_11, %c2] : memref<3x4xf32, #tpu.memory_space<smem>>
    %c0_12 = arith.constant 0 : index
    %c2_13 = arith.constant 2 : index
    %c0_14 = arith.constant 0 : index
    %c0_15 = arith.constant 0 : index
    %15 = vector.load %arg2[%c0_12, %c2_13, %c0_14, %c0_15] : memref<1x4x2x128xf32, #tpu.memory_space<vmem>>, vector<1x1x2x128xf32>
    %16 = vector.shape_cast %15 : vector<1x1x2x128xf32> to vector<2x128xf32>
    %17 = vector.broadcast %14 : f32 to vector<2x128xf32>
    %18 = arith.mulf %17, %16 : vector<2x128xf32>
    %19 = arith.addf %13, %18 : vector<2x128xf32>
    %c0_16 = arith.constant 0 : index
    %c3 = arith.constant 3 : index
    %20 = memref.load %arg3[%c0_16, %c3] : memref<3x4xf32, #tpu.memory_space<smem>>
    %c0_17 = arith.constant 0 : index
    %c3_18 = arith.constant 3 : index
    %c0_19 = arith.constant 0 : index
    %c0_20 = arith.constant 0 : index
    %21 = vector.load %arg2[%c0_17, %c3_18, %c0_19, %c0_20] : memref<1x4x2x128xf32, #tpu.memory_space<vmem>>, vector<1x1x2x128xf32>
    %22 = vector.shape_cast %21 : vector<1x1x2x128xf32> to vector<2x128xf32>
    %23 = vector.broadcast %20 : f32 to vector<2x128xf32>
    %24 = arith.mulf %23, %22 : vector<2x128xf32>
    %25 = arith.addf %19, %24 : vector<2x128xf32>
    %c0_21 = arith.constant 0 : index
    %c0_22 = arith.constant 0 : index
    %c0_23 = arith.constant 0 : index
    %c0_24 = arith.constant 0 : index
    %26 = vector.load %arg5[%c0_21, %c0_22, %c0_23, %c0_24] : memref<1x3x2x128xf32, #tpu.memory_space<vmem>>, vector<1x1x2x128xf32>
    %27 = vector.shape_cast %26 : vector<1x1x2x128xf32> to vector<2x128xf32>
    %28 = vector.shape_cast %25 : vector<2x128xf32> to vector<1x1x2x128xf32>
    tpu.vector_store %arg5[%c0_21, %c0_22, %c0_23, %c0_24], %28 {strides = array<i32>} : memref<1x3x2x128xf32, #tpu.memory_space<vmem>>, vector<1x1x2x128xf32>,
    %c1_25 = arith.constant 1 : index
    %29 = memref.load %arg4[%c1_25] : memref<3xf32, #tpu.memory_space<smem>>
    %30 = vector.broadcast %29 : f32 to vector<2x128xf32>
    %c1_26 = arith.constant 1 : index
    %c0_27 = arith.constant 0 : index
    %31 = memref.load %arg3[%c1_26, %c0_27] : memref<3x4xf32, #tpu.memory_space<smem>>
    %c0_28 = arith.constant 0 : index
    %c0_29 = arith.constant 0 : index
    %c0_30 = arith.constant 0 : index
    %c0_31 = arith.constant 0 : index
    %32 = vector.load %arg2[%c0_28, %c0_29, %c0_30, %c0_31] : memref<1x4x2x128xf32, #tpu.memory_space<vmem>>, vector<1x1x2x128xf32>
    %33 = vector.shape_cast %32 : vector<1x1x2x128xf32> to vector<2x128xf32>
    %34 = vector.broadcast %31 : f32 to vector<2x128xf32>
    %35 = arith.mulf %34, %33 : vector<2x128xf32>
    %36 = arith.addf %30, %35 : vector<2x128xf32>
    %c1_32 = arith.constant 1 : index
    %c1_33 = arith.constant 1 : index
    %37 = memref.load %arg3[%c1_32, %c1_33] : memref<3x4xf32, #tpu.memory_space<smem>>
    %c0_34 = arith.constant 0 : index
    %c1_35 = arith.constant 1 : index
    %c0_36 = arith.constant 0 : index
    %c0_37 = arith.constant 0 : index
    %38 = vector.load %arg2[%c0_34, %c1_35, %c0_36, %c0_37] : memref<1x4x2x128xf32, #tpu.memory_space<vmem>>, vector<1x1x2x128xf32>
    %39 = vector.shape_cast %38 : vector<1x1x2x128xf32> to vector<2x128xf32>
    %40 = vector.broadcast %37 : f32 to vector<2x128xf32>
    %41 = arith.mulf %40, %39 : vector<2x128xf32>
    %42 = arith.addf %36, %41 : vector<2x128xf32>
    %c1_38 = arith.constant 1 : index
    %c2_39 = arith.constant 2 : index
    %43 = memref.load %arg3[%c1_38, %c2_39] : memref<3x4xf32, #tpu.memory_space<smem>>
    %c0_40 = arith.constant 0 : index
    %c2_41 = arith.constant 2 : index
    %c0_42 = arith.constant 0 : index
    %c0_43 = arith.constant 0 : index
    %44 = vector.load %arg2[%c0_40, %c2_41, %c0_42, %c0_43] : memref<1x4x2x128xf32, #tpu.memory_space<vmem>>, vector<1x1x2x128xf32>
    %45 = vector.shape_cast %44 : vector<1x1x2x128xf32> to vector<2x128xf32>
    %46 = vector.broadcast %43 : f32 to vector<2x128xf32>
    %47 = arith.mulf %46, %45 : vector<2x128xf32>
    %48 = arith.addf %42, %47 : vector<2x128xf32>
    %c1_44 = arith.constant 1 : index
    %c3_45 = arith.constant 3 : index
    %49 = memref.load %arg3[%c1_44, %c3_45] : memref<3x4xf32, #tpu.memory_space<smem>>
    %c0_46 = arith.constant 0 : index
    %c3_47 = arith.constant 3 : index
    %c0_48 = arith.constant 0 : index
    %c0_49 = arith.constant 0 : index
    %50 = vector.load %arg2[%c0_46, %c3_47, %c0_48, %c0_49] : memref<1x4x2x128xf32, #tpu.memory_space<vmem>>, vector<1x1x2x128xf32>
    %51 = vector.shape_cast %50 : vector<1x1x2x128xf32> to vector<2x128xf32>
    %52 = vector.broadcast %49 : f32 to vector<2x128xf32>
    %53 = arith.mulf %52, %51 : vector<2x128xf32>
    %54 = arith.addf %48, %53 : vector<2x128xf32>
    %c0_50 = arith.constant 0 : index
    %c1_51 = arith.constant 1 : index
    %c0_52 = arith.constant 0 : index
    %c0_53 = arith.constant 0 : index
    %55 = vector.load %arg5[%c0_50, %c1_51, %c0_52, %c0_53] : memref<1x3x2x128xf32, #tpu.memory_space<vmem>>, vector<1x1x2x128xf32>
    %56 = vector.shape_cast %55 : vector<1x1x2x128xf32> to vector<2x128xf32>
    %57 = vector.shape_cast %54 : vector<2x128xf32> to vector<1x1x2x128xf32>
    tpu.vector_store %arg5[%c0_50, %c1_51, %c0_52, %c0_53], %57 {strides = array<i32>} : memref<1x3x2x128xf32, #tpu.memory_space<vmem>>, vector<1x1x2x128xf32>,
    %c2_54 = arith.constant 2 : index
    %58 = memref.load %arg4[%c2_54] : memref<3xf32, #tpu.memory_space<smem>>
    %59 = vector.broadcast %58 : f32 to vector<2x128xf32>
    %c2_55 = arith.constant 2 : index
    %c0_56 = arith.constant 0 : index
    %60 = memref.load %arg3[%c2_55, %c0_56] : memref<3x4xf32, #tpu.memory_space<smem>>
    %c0_57 = arith.constant 0 : index
    %c0_58 = arith.constant 0 : index
    %c0_59 = arith.constant 0 : index
    %c0_60 = arith.constant 0 : index
    %61 = vector.load %arg2[%c0_57, %c0_58, %c0_59, %c0_60] : memref<1x4x2x128xf32, #tpu.memory_space<vmem>>, vector<1x1x2x128xf32>
    %62 = vector.shape_cast %61 : vector<1x1x2x128xf32> to vector<2x128xf32>
    %63 = vector.broadcast %60 : f32 to vector<2x128xf32>
    %64 = arith.mulf %63, %62 : vector<2x128xf32>
    %65 = arith.addf %59, %64 : vector<2x128xf32>
    %c2_61 = arith.constant 2 : index
    %c1_62 = arith.constant 1 : index
    %66 = memref.load %arg3[%c2_61, %c1_62] : memref<3x4xf32, #tpu.memory_space<smem>>
    %c0_63 = arith.constant 0 : index
    %c1_64 = arith.constant 1 : index
    %c0_65 = arith.constant 0 : index
    %c0_66 = arith.constant 0 : index
    %67 = vector.load %arg2[%c0_63, %c1_64, %c0_65, %c0_66] : memref<1x4x2x128xf32, #tpu.memory_space<vmem>>, vector<1x1x2x128xf32>
    %68 = vector.shape_cast %67 : vector<1x1x2x128xf32> to vector<2x128xf32>
    %69 = vector.broadcast %66 : f32 to vector<2x128xf32>
    %70 = arith.mulf %69, %68 : vector<2x128xf32>
    %71 = arith.addf %65, %70 : vector<2x128xf32>
    %c2_67 = arith.constant 2 : index
    %c2_68 = arith.constant 2 : index
    %72 = memref.load %arg3[%c2_67, %c2_68] : memref<3x4xf32, #tpu.memory_space<smem>>
    %c0_69 = arith.constant 0 : index
    %c2_70 = arith.constant 2 : index
    %c0_71 = arith.constant 0 : index
    %c0_72 = arith.constant 0 : index
    %73 = vector.load %arg2[%c0_69, %c2_70, %c0_71, %c0_72] : memref<1x4x2x128xf32, #tpu.memory_space<vmem>>, vector<1x1x2x128xf32>
    %74 = vector.shape_cast %73 : vector<1x1x2x128xf32> to vector<2x128xf32>
    %75 = vector.broadcast %72 : f32 to vector<2x128xf32>
    %76 = arith.mulf %75, %74 : vector<2x128xf32>
    %77 = arith.addf %71, %76 : vector<2x128xf32>
    %c2_73 = arith.constant 2 : index
    %c3_74 = arith.constant 3 : index
    %78 = memref.load %arg3[%c2_73, %c3_74] : memref<3x4xf32, #tpu.memory_space<smem>>
    %c0_75 = arith.constant 0 : index
    %c3_76 = arith.constant 3 : index
    %c0_77 = arith.constant 0 : index
    %c0_78 = arith.constant 0 : index
    %79 = vector.load %arg2[%c0_75, %c3_76, %c0_77, %c0_78] : memref<1x4x2x128xf32, #tpu.memory_space<vmem>>, vector<1x1x2x128xf32>
    %80 = vector.shape_cast %79 : vector<1x1x2x128xf32> to vector<2x128xf32>
    %81 = vector.broadcast %78 : f32 to vector<2x128xf32>
    %82 = arith.mulf %81, %80 : vector<2x128xf32>
    %83 = arith.addf %77, %82 : vector<2x128xf32>
    %c0_79 = arith.constant 0 : index
    %c2_80 = arith.constant 2 : index
    %c0_81 = arith.constant 0 : index
    %c0_82 = arith.constant 0 : index
    %84 = vector.load %arg5[%c0_79, %c2_80, %c0_81, %c0_82] : memref<1x3x2x128xf32, #tpu.memory_space<vmem>>, vector<1x1x2x128xf32>
    %85 = vector.shape_cast %84 : vector<1x1x2x128xf32> to vector<2x128xf32>
    %86 = vector.shape_cast %83 : vector<2x128xf32> to vector<1x1x2x128xf32>
    tpu.vector_store %arg5[%c0_79, %c2_80, %c0_81, %c0_82], %86 {strides = array<i32>} : memref<1x3x2x128xf32, #tpu.memory_space<vmem>>, vector<1x1x2x128xf32>,
    return
  }
  func.func @transform_0(%arg0: i32, %arg1: i32) -> (i32, i32, i32, i32) {
    %c0_i32 = arith.constant 0 : i32
    %c0_i32_0 = arith.constant 0 : i32
    %c0_i32_1 = arith.constant 0 : i32
    return %arg0, %c0_i32, %arg1, %c0_i32_0 : i32, i32, i32, i32
  }
  func.func @transform_1(%arg0: i32, %arg1: i32) -> (i32, i32) {
    %c0_i32 = arith.constant 0 : i32
    %c0_i32_0 = arith.constant 0 : i32
    %c0_i32_1 = arith.constant 0 : i32
    return %c0_i32, %c0_i32_0 : i32, i32
  }
  func.func @transform_2(%arg0: i32, %arg1: i32) -> i32 {
    %c0_i32 = arith.constant 0 : i32
    %c0_i32_0 = arith.constant 0 : i32
    return %c0_i32 : i32
  }
  func.func @transform_3(%arg0: i32, %arg1: i32) -> (i32, i32, i32, i32) {
    %c0_i32 = arith.constant 0 : i32
    %c0_i32_0 = arith.constant 0 : i32
    %c0_i32_1 = arith.constant 0 : i32
    return %arg0, %c0_i32, %arg1, %c0_i32_0 : i32, i32, i32, i32
  }
}

</mosaic_0001>

<bundles_post_ra>
// kernel: outconv_pallas.1
= control target key start
LH: loop header
LB: loop body
LE: loop exit
PB: predicated region body
PF: predicated region fallthrough
CT: control target
= control target key end

     0   :  { %8 = vsyncpa [#allocation3], 0  ;;  %s696_s0 = inlined_call_operand.vmem [shape: f32[2,4,2,128], index: 0, kind: input, shape index: {}]   ;;  %s697_s1 = inlined_call_operand.vmem [shape: f32[3,4], index: 1, kind: input, shape index: {}]   ;;  %s698_s2 = inlined_call_operand.vmem [shape: f32[3], index: 2, kind: input, shape index: {}]   ;;  %s699_s3 = inlined_call_operand.vmem [shape: f32[2,3,2,128], index: 3, kind: output, shape index: {}]  }
   0x1   :  { %9 = vsyncpa [#allocation5], 0  ;;  %s578_s12 = smov 0   ;;  %s580_s13 = smov 0  }
   0x2   :  { %s582_s14 = smov 0  }
   0x3 LB: > { %s409_s15 = sadd.s32 4294967295, %s554_s14   ;;  %s27_s16 = sadd.s32 1, %s550_s13  ;;  %s554_s14 = sphi %s582_s14, %s15_s14   ;;  %s550_s13 = sphi %s580_s13, %s709_s13   ;;  %s546_s12 = sphi %s578_s12, %s708_s12  }
   0x4   : > { %p29_p0 = scmp.ge.s32.totalorder %s27_s16, 2  ;;  %p411_p1 = scmp.ge.s32.totalorder %s554_s14, 1 }
   0x5   : > { %p130_p2 = scmp.lt.s32.totalorder %s554_s14, 3  ;;  %p603_p4 = scmp.eq.s32.totalorder %s409_s15, 0 }
   0x6   : > { %s711_s16 = smov (%p29_p0, %s27_s16), 0  ;;  %s143_s21 = sshll.u32 %s697_s1, 4  ;;  %s144_s21 = int_to_ptr.vmem [resolvable:$true] %s143_s21 }
   0x7   : > { %p599_p3 = pnand %p411_p1, %p130_p2  ;;  %s154_s24 = sshll.u32 %s698_s2, 4  ;;  %s155_s24 = int_to_ptr.vmem [resolvable:$true] %s154_s24 }
   0x8   : > { %s704_s18 = scalar_select %p603_p4, 1, 0 }
   0x9   : > { %s703_s17 = scalar_select %p599_p3, 1, 0 }
   0xa   : > { %p457_p5 = pneg %p599_p3  ;;  %s494_s26 = scalar_lea.vmem %s144_s21, 64 }
   0xb   : > { %p495_p7 = scmp.ne.s32.totalorder %s144_s21, %s494_s26  ;;  %p502_p11 = scmp.lt.s32.totalorder %s144_s21, %s144_s21 }
   0xc   : > { %p617_p6 = pnand %p603_p4, %p457_p5  ;;  %p503_p12 = scmp.lt.s32.totalorder %s494_s26, %s494_s26 }
   0xe   : > { %p496_p8 = pneg %p617_p6  ;;  %p504_p13 = por %p503_p12, %p502_p11 }
  0x10   : > { %p497_p9 = pnand %p496_p8, %p495_p7 }
  0x12   : > { %p498_p10 = pneg %p497_p9 }
  0x14   : > { %p505_p0 = pnand %p504_p13, %p498_p10 }
  0x16   : > { %508 = shalt.err (!%p505_p0)
}
  0x17   : > { %s556_s27 = smov [#allocation2]   ;;  %s509_s28 = scalar_lea.vmem %s155_s24, 16 }
  0x18   : > { %460 = dma.vmem_to_smem (!%p617_p6), %s144_s21, 64, %s556_s27, [#allocation3]  }
  0x19   : > { %p510_p1 = scmp.ne.s32.totalorder %s155_s24, %s509_s28  ;;  %p517_p4 = scmp.lt.s32.totalorder %s155_s24, %s155_s24 }
  0x1a   : > { %p518_p3 = scmp.lt.s32.totalorder %s509_s28, %s509_s28 }
  0x1b   : > { %p512_p2 = pnand %p510_p1, %p496_p8 }
  0x1c   : > { %p519_p7 = por %p518_p3, %p517_p4 }
  0x1d   : > { %p513_p5 = pneg %p512_p2 }
  0x1f   : > { %p520_p9 = pnand %p519_p7, %p513_p5 }
  0x21   : > { %523 = shalt.err (!%p520_p9)
}
  0x22   : > { %s557_s29 = smov [#allocation4]   ;;  %p706_p10 = scmp.ne.s32.totalorder %s703_s17, 0 }
  0x23   : > { %463 = dma.vmem_to_smem (!%p617_p6), %s155_s24, 16, %s557_s29, [#allocation5]  }
  0x24   : > { %178 = sbr.rel (%p706_p10) target bundleno = 75 (0x4b), region = 32  ;;  %p707_p11 = scmp.ne.s32.totalorder (!%p706_p10), %s704_s18, 0 }
  0x2b   : > { %537 = dma.done.wait (%p707_p11), [#allocation3], 64  }
  0x2c   : > { %539 = vsyncadd (%p707_p11), [#allocation3], 4294967232 }
  0x2d   : > { %541 = dma.done.wait (%p707_p11), [#allocation5], 16  }
  0x2e   : > { %543 = vsyncadd (%p707_p11), [#allocation5], 4294967280 }
  0x2f   : > { %188 = sfence }
  0x30   : > { %p213_p3 = scmp.lt.s32.totalorder %s546_s12, 1  ;;  %s229_s30 = sld [smem:[#allocation4]] }
  0x31   : > { %s231_s4 = sld [smem:[#allocation2]]  ;;  %s421_s5 = sld [smem:[#allocation2 + $0x1]] }
  0x32   : > { %s713_s12 = smov (!%p213_p3, %s546_s12), 1  ;;  %s423_s6 = sld [smem:[#allocation2 + $0x2]] }
  0x33   : > { %s425_s7 = sld [smem:[#allocation2 + $0x3]]  ;;  %s447_s8 = sshll.u32 %s713_s12, 3 }
  0x34   : > { %s645_s11 = scalar_lea.vmem %s696_s0, %s447_s8  ;;  %s647_s15 = sld [smem:[#allocation4 + $0x1]] }
  0x35   : > { %v232_v0 = vld [vmem:[%s645_s11] sm:$0x3]  ;;  %v422_v1 = vld [vmem:[%s645_s11 + $0x2] sm:$0x3]  ;;  %v424_v5 = vld [vmem:[%s645_s11 + $0x4] sm:$0x3] }
  0x36   : > { %v230_v2 = vstv %s229_s30  ;;  %s428_s17 = sld [smem:[#allocation2 + $0x80]]  ;;  %s429_s18 = sld [smem:[#allocation2 + $0x81]]  ;;  %v426_v9 = vld [vmem:[%s645_s11 + $0x6] sm:$0x3]  ;;  %v258_v13 = vld [vmem:[%s645_s11] sm:$0x3] }
  0x37   : > { %v233_v3 = vstv %s231_s4  ;;  %v239_v4 = vstv %s421_s5  ;;  %s652_s19 = sld [smem:[#allocation2 + $0x82]]  ;;  %s448_s20 = smul.u32 6, %s713_s12  ;;  %v430_v16 = vld [vmem:[%s645_s11 + $0x2] sm:$0x3]  ;;  %v432_v19 = vld [vmem:[%s645_s11 + $0x4] sm:$0x3] }
  0x38   : > { %v234_v6 = vmul.f32 %v233_v3, %v232_v0  ;;  %v240_v7 = vmul.f32 %v422_v1, %v239_v4  ;;  %v245_v8 = vstv %s423_s6  ;;  %s656_s21 = sld [smem:[#allocation2 + $0x83]]  ;;  %s658_s22 = sld [smem:[#allocation4 + $0x2]]  ;;  %v434_v25 = vld [vmem:[%s645_s11 + $0x6] sm:$0x3]  ;;  %v282_v27 = vld [vmem:[%s645_s11] sm:$0x3] }
  0x39   : > { %v251_v10 = vstv %s425_s7  ;;  %v246_v12 = vmul.f32 %v424_v5, %v245_v8  ;;  %s660_s23 = sld [smem:[#allocation2 + $0x100]]  ;;  %s663_s24 = sld [smem:[#allocation2 + $0x101]]  ;;  %v439_v28 = vld [vmem:[%s645_s11 + $0x2] sm:$0x3]  ;;  %v441_v32 = vld [vmem:[%s645_s11 + $0x4] sm:$0x3] }
  0x3a   : > { %v235_v11 = vadd.f32 %v234_v6, %v230_v2  ;;  %s665_s12 = sld [smem:[#allocation2 + $0x102]]  ;;  %v252_v15 = vmul.f32 %v426_v9, %v251_v10  ;;  %s668_s25 = sld [smem:[#allocation2 + $0x103]]  ;;  %v256_v17 = vstv %s647_s15  ;;  %v443_v41 = vld [vmem:[%s645_s11 + $0x6] sm:$0x3] }
  0x3b   : > { %s228_s28 = scalar_lea.vmem %s699_s3, %s448_s20 }
  0x3c   : > { %v241_v14 = vadd.f32 %v240_v7, %v235_v11  ;;  %v259_v18 = vstv %s428_s17  ;;  %v264_v22 = vstv %s429_s18 }
  0x3d   : > { %v260_v21 = vmul.f32 %v259_v18, %v258_v13  ;;  %v269_v23 = vstv %s652_s19  ;;  %v265_v24 = vmul.f32 %v430_v16, %v264_v22 }
  0x3e   : > { %v247_v20 = vadd.f32 %v246_v12, %v241_v14  ;;  %v274_v26 = vstv %s656_s21  ;;  %v270_v31 = vmul.f32 %v432_v19, %v269_v23  ;;  %v280_v33 = vstv %s658_s22 }
  0x3f   : > { %v261_v30 = vadd.f32 %v260_v21, %v256_v17  ;;  %v283_v34 = vstv %s660_s23  ;;  %v288_v35 = vstv %s663_s24  ;;  %v275_v38 = vmul.f32 %v434_v25, %v274_v26 }
  0x40   : > { %v253_v29 = vadd.f32 %v252_v15, %v247_v20  ;;  %v293_v36 = vstv %s665_s12  ;;  %v284_v39 = vmul.f32 %v283_v34, %v282_v27  ;;  %v289_v40 = vmul.f32 %v439_v28, %v288_v35 }
  0x41   : > { %v266_v37 = vadd.f32 %v265_v24, %v261_v30  ;;  %v298_v42 = vstv %s668_s25  ;;  %v294_v45 = vmul.f32 %v441_v32, %v293_v36 }
  0x42   : > { %254 = vst [vmem:[%s228_s28] sm:$0x3] %v253_v29  ;;  %v285_v44 = vadd.f32 %v284_v39, %v280_v33  ;;  %v299_v48 = vmul.f32 %v443_v41, %v298_v42 }
  0x43   : > { %v271_v43 = vadd.f32 %v270_v31, %v266_v37 }
  0x44   : > { %v290_v47 = vadd.f32 %v289_v40, %v285_v44 }
  0x45   : > { %v276_v46 = vadd.f32 %v275_v38, %v271_v43 }
  0x46   : > { %v295_v49 = vadd.f32 %v294_v45, %v290_v47 }
  0x47   : > { %435 = vst [vmem:[%s228_s28 + $0x2] sm:$0x3] %v276_v46 }
  0x48   : > { %v300_v50 = vadd.f32 %v299_v48, %v295_v49 }
  0x4a   : > { %444 = vst [vmem:[%s228_s28 + $0x4] sm:$0x3] %v300_v50 }
  0x4b PF: > { %s15_s14 = sadd.s32 1, %s554_s14   ;;  %s708_s12 = smov %s550_s13 }
  0x4c   : > { %p12_p4 = scmp.ge.s32.totalorder %s15_s14, 4   ;;  %s709_s13 = smov %s711_s16 }
  0x4e   :  { %14 = sbr.rel (!%p12_p4) target bundleno = 3 (0x3), region = 76 }
  0x55   :  { %330 = vsyncpa [#allocation3], 1 }
  0x56   :  { %332 = vsyncpa [#allocation3 + $0x1], 1 }
  0x57   :  { %333 = vsyncpa [#allocation5], 1 }

</bundles_post_ra>
